<compile_context>
chip_gen: v6e
topology: v6e:2x2x1
jax: 0.10.0
libtpu: 0.0.40
codegen_flags: <defaults>
</compile_context>

<pallas_src>
import jax
import jax.numpy as jnp
from jax import lax
from jax.experimental import pallas as pl
from jax.experimental.pallas import tpu as pltpu

HIDDEN_DIM = 32
INPUT_DIM = 1
NUM_LAYERS = 2
OUTPUT_DIM = 1
SUBLANE = 8      # f32 sublane count
OUT_LANES = 128  # lane-dense output tile width


def _lstm_kernel(x_ref, w_big_ref, wx_ref, bx_ref, fcw_ref, fcb_ref, out_ref):
    """Fused 2-layer LSTM recurrence + final fc.

    x_ref    : (T+1, Bp, 1)  raw input, time-major, batch padded, +1 zero step
    w_big_ref: (2H, 8H)      stationary fused weight, gate-interleaved columns
                             rows 0:H  <- h0_t   : [whh0_i wih1_i whh0_f wih1_f ...]
                             rows H:2H <- h1_{t-1}: [  0    whh1_i   0   whh1_f ...]
    wx_ref   : (1, 8H)       per-gate x multiplier  [wih0_i 0 wih0_f 0 ...]
    bx_ref   : (1, 8H)       per-gate bias          [b0_i  b1_i  b0_f  b1_f ...]
    fcw_ref  : (1, H)        fc weight row
    fcb_ref  : (1, 1)        fc bias
    out_ref  : (Bp, 128)     fc(h1_{T-1}) broadcast across all 128 lanes
    """
    Tp1, Bp, _ = x_ref.shape
    T = Tp1 - 1
    H = HIDDEN_DIM
    H2 = 2 * H
    H8 = 8 * H

    # ---- hoist loop-invariant loads / broadcasts (review #5) ----
    w_big = w_big_ref[...]                                   # (2H, 8H)
    wx_b = jnp.broadcast_to(wx_ref[...], (Bp, H8))           # (Bp, 8H)
    bx_b = jnp.broadcast_to(bx_ref[...], (Bp, H8))           # (Bp, 8H)

    # ---- prologue: layer-0 cell at t = 0 (h0_{-1} = c0_{-1} = 0) ----
    # Pure VPU: Din = 1 so the input projection is a broadcast multiply.
    add0 = x_ref[0] * wx_b + bx_b                            # (Bp, 8H)
    i0 = jax.nn.sigmoid(add0[:, 0 * H:1 * H])                # layer-0 gate slots
    g0 = jnp.tanh(add0[:, 4 * H:5 * H])
    o0 = jax.nn.sigmoid(add0[:, 6 * H:7 * H])
    c0 = i0 * g0
    h0 = o0 * jnp.tanh(c0)
    zeros = jnp.zeros((Bp, H), jnp.float32)
    h_cat = jnp.concatenate([h0, zeros], axis=1)             # [h0_0   | h1_{-1}=0]
    c_cat = jnp.concatenate([c0, zeros], axis=1)             # [c0_0   | c1_{-1}=0]

    def step(t, carry):
        h_cat, c_cat = carry                                 # [h0_t | h1_{t-1}], [c0_t | c1_{t-1}]
        # One stationary-RHS matmul produces layer-1 pre @ t AND layer-0
        # recurrent pre @ t+1, gate-interleaved along 256 lanes.
        add = x_ref[t + 1] * wx_b + bx_b                     # x-proj(t+1) + biases
        pre = jnp.dot(h_cat, w_big,
                      preferred_element_type=jnp.float32) + add   # (Bp, 8H)
        # One sigmoid + one tanh push over the whole 2-vreg pre buffer.
        sg = jax.nn.sigmoid(pre)
        th = jnp.tanh(pre)
        i_cat = sg[:, 0 * H2:1 * H2]                         # [i0_{t+1} | i1_t]
        f_cat = sg[:, 1 * H2:2 * H2]
        g_cat = th[:, 2 * H2:3 * H2]
        o_cat = sg[:, 3 * H2:4 * H2]
        c_cat = f_cat * c_cat + i_cat * g_cat                # [c0_{t+1} | c1_t]
        h_cat = o_cat * jnp.tanh(c_cat)                      # [h0_{t+1} | h1_t]
        return h_cat, c_cat

    h_cat, _ = lax.fori_loop(0, T, step, (h_cat, c_cat), unroll=min(T, 8))

    # ---- fused fc: y = h1_{T-1} @ fc_w.T + fc_b (VPU mul + XLU lane reduce) ----
    h1_last = h_cat[:, H:2 * H]                              # (Bp, H)
    y = jnp.sum(h1_last * fcw_ref[...], axis=1, keepdims=True) + fcb_ref[...]
    out_ref[...] = jnp.broadcast_to(y, out_ref.shape)        # lane-dense store


def init_params(key, input_dim=INPUT_DIM, hidden_dim=HIDDEN_DIM,
                output_dim=OUTPUT_DIM):
    """Deterministic init matching PyTorch shapes (uniform(-1/sqrt(H), 1/sqrt(H)))."""
    H = hidden_dim
    k = 1.0 / jnp.sqrt(jnp.float32(H))
    keys = jax.random.split(key, 10)

    def u(kk, shape):
        return jax.random.uniform(kk, shape, jnp.float32, -k, k)

    return {
        "w_ih_l0": u(keys[0], (4 * H, input_dim)),
        "w_hh_l0": u(keys[1], (4 * H, H)),
        "b_ih_l0": u(keys[2], (4 * H,)),
        "b_hh_l0": u(keys[3], (4 * H,)),
        "w_ih_l1": u(keys[4], (4 * H, H)),
        "w_hh_l1": u(keys[5], (4 * H, H)),
        "b_ih_l1": u(keys[6], (4 * H,)),
        "b_hh_l1": u(keys[7], (4 * H,)),
        "fc_w":    u(keys[8], (output_dim, H)),
        "fc_b":    u(keys[9], (output_dim,)),
    }


def pack_params(params):
    """One-time weight packing (hoisted off the per-call hot path).

    Column layout of the fused 8H axis (blocks of H lanes, PyTorch gate order
    i, f, g, o): [i0 i1 | f0 f1 | g0 g1 | o0 o1], where suffix 0 = layer-0 cell
    at step t+1 and suffix 1 = layer-1 cell at step t.
    """
    H = HIDDEN_DIM
    f32 = jnp.float32

    wih1T = params["w_ih_l1"].T.astype(f32).reshape(H, 4, H)   # h0 -> layer-1 gates
    whh1T = params["w_hh_l1"].T.astype(f32).reshape(H, 4, H)   # h1 -> layer-1 gates
    whh0T = params["w_hh_l0"].T.astype(f32).reshape(H, 4, H)   # h0 -> layer-0 gates
    zblk = jnp.zeros((H, 4, H), f32)
    top = jnp.stack([whh0T, wih1T], axis=2).reshape(H, 8 * H)  # rows 0:H  (h0)
    bot = jnp.stack([zblk, whh1T], axis=2).reshape(H, 8 * H)   # rows H:2H (h1)
    w_big = jnp.concatenate([top, bot], axis=0)                # (2H, 8H)

    wih0 = params["w_ih_l0"].astype(f32).reshape(4, H)         # Din = 1
    wx = jnp.stack([wih0, jnp.zeros((4, H), f32)], axis=1).reshape(1, 8 * H)

    b0 = (params["b_ih_l0"] + params["b_hh_l0"]).astype(f32).reshape(4, H)
    b1 = (params["b_ih_l1"] + params["b_hh_l1"]).astype(f32).reshape(4, H)
    bx = jnp.stack([b0, b1], axis=1).reshape(1, 8 * H)

    fcw = params["fc_w"].astype(f32).reshape(1, H)
    fcb = params["fc_b"].astype(f32).reshape(1, 1)
    return {"w_big": w_big, "wx": wx, "bx": bx, "fcw": fcw, "fcb": fcb}


def _lstm_forward_impl(x, packed):
    """x: (B, T, 1) float32, packed: output of pack_params -> (B, OUTPUT_DIM)."""
    B, T, Din = x.shape
    assert Din == INPUT_DIM and OUTPUT_DIM == 1
    Bp = max(SUBLANE, ((B + SUBLANE - 1) // SUBLANE) * SUBLANE)

    # time-major, batch padded to the sublane count, +1 zero timestep so the
    # fused look-ahead read x[t+1] at t = T-1 stays in bounds.
    x_tm = jnp.transpose(x.astype(jnp.float32), (1, 0, 2))     # (T, B, 1)
    x_tm = jnp.pad(x_tm, ((0, 1), (0, Bp - B), (0, 0)))        # (T+1, Bp, 1)

    vmem = pl.BlockSpec(memory_space=pltpu.MemorySpace.VMEM)
    out = pl.pallas_call(
        _lstm_kernel,
        out_shape=jax.ShapeDtypeStruct((Bp, OUT_LANES), jnp.float32),
        in_specs=[vmem] * 6,
        out_specs=vmem,
    )(x_tm, packed["w_big"], packed["wx"], packed["bx"],
      packed["fcw"], packed["fcb"])

    return out[:B, :OUTPUT_DIM]


lstm_forward_packed = jax.jit(_lstm_forward_impl)


def lstm_forward(x, params):
    """Convenience wrapper: packs weights then runs the jitted kernel."""
    return lstm_forward_packed(x, pack_params(params))


def lstm_forward_ref(x, params):
    """Pure-JAX reference (mirrors PyTorch nn.LSTM + nn.Linear semantics)."""
    B, T, Din = x.shape
    H = HIDDEN_DIM

    def layer(inp, w_ih, w_hh, b_ih, b_hh):
        h = jnp.zeros((B, H), jnp.float32)
        c = jnp.zeros((B, H), jnp.float32)
        outs = []
        for t in range(T):
            pre = inp[:, t, :] @ w_ih.T + h @ w_hh.T + b_ih + b_hh
            i = jax.nn.sigmoid(pre[:, 0 * H:1 * H])
            f = jax.nn.sigmoid(pre[:, 1 * H:2 * H])
            g = jnp.tanh(pre[:, 2 * H:3 * H])
            o = jax.nn.sigmoid(pre[:, 3 * H:4 * H])
            c = f * c + i * g
            h = o * jnp.tanh(c)
            outs.append(h)
        return jnp.stack(outs, axis=1)

    out0 = layer(x, params["w_ih_l0"], params["w_hh_l0"],
                 params["b_ih_l0"], params["b_hh_l0"])
    out1 = layer(out0, params["w_ih_l1"], params["w_hh_l1"],
                 params["b_ih_l1"], params["b_hh_l1"])
    return out1[:, -1, :] @ params["fc_w"].T + params["fc_b"]


if __name__ == "__main__":
    key = jax.random.PRNGKey(0)
    k_x, k_p = jax.random.split(key)

    B, T = 2, 8
    x = jax.random.normal(k_x, (B, T, INPUT_DIM), jnp.float32)
    params = init_params(k_p)

    packed = pack_params(params)          # one-time weight packing (cached)
    y = lstm_forward_packed(x, packed)
    y = jax.block_until_ready(y)

    y_ref = lstm_forward_ref(x, params)
    assert y.shape == (B, OUTPUT_DIM)
    assert jnp.allclose(y, y_ref, atol=1e-4, rtol=1e-4), (y, y_ref)

    print("KERNEL_OK")
</pallas_src>

<mosaic_0001>
module attributes {stable_mosaic.version = 11 : i64} {
  func.func @_lstm_kernel(%arg0: memref<9x8x1xf32, #tpu.memory_space<vmem>>, %arg1: memref<64x256xf32, #tpu.memory_space<vmem>>, %arg2: memref<1x256xf32, #tpu.memory_space<vmem>>, %arg3: memref<1x256xf32, #tpu.memory_space<vmem>>, %arg4: memref<1x32xf32, #tpu.memory_space<vmem>>, %arg5: memref<1x1xf32, #tpu.memory_space<vmem>>, %arg6: memref<8x128xf32, #tpu.memory_space<vmem>>) attributes {dimension_semantics = [], scalar_prefetch = 0 : i64, scratch_operands = 0 : i64, tpu.core_type = #tpu.core_type<tc>} {
    %c0 = arith.constant 0 : index
    %c0_0 = arith.constant 0 : index
    %0 = vector.load %arg1[%c0, %c0_0] : memref<64x256xf32, #tpu.memory_space<vmem>>, vector<64x256xf32>
    %c0_1 = arith.constant 0 : index
    %c0_2 = arith.constant 0 : index
    %1 = vector.load %arg2[%c0_1, %c0_2] : memref<1x256xf32, #tpu.memory_space<vmem>>, vector<1x256xf32>
    %2 = vector.shape_cast %1 : vector<1x256xf32> to vector<1x256xf32>
    %3 = vector.broadcast %2 : vector<1x256xf32> to vector<8x256xf32>
    %c0_3 = arith.constant 0 : index
    %c0_4 = arith.constant 0 : index
    %4 = vector.load %arg3[%c0_3, %c0_4] : memref<1x256xf32, #tpu.memory_space<vmem>>, vector<1x256xf32>
    %5 = vector.shape_cast %4 : vector<1x256xf32> to vector<1x256xf32>
    %6 = vector.broadcast %5 : vector<1x256xf32> to vector<8x256xf32>
    %c0_5 = arith.constant 0 : index
    %c0_6 = arith.constant 0 : index
    %c0_7 = arith.constant 0 : index
    %7 = vector.load %arg0[%c0_5, %c0_6, %c0_7] : memref<9x8x1xf32, #tpu.memory_space<vmem>>, vector<1x8x1xf32>
    %8 = vector.shape_cast %7 : vector<1x8x1xf32> to vector<8x1xf32>
    %9 = vector.broadcast %8 : vector<8x1xf32> to vector<8x256xf32>
    %10 = arith.mulf %9, %3 : vector<8x256xf32>
    %11 = arith.addf %10, %6 : vector<8x256xf32>
    %12 = vector.extract_strided_slice %11 {offsets = [0, 0], sizes = [8, 32], strides = [1, 1]} : vector<8x256xf32> to vector<8x32xf32>
    %13 = arith.negf %12 : vector<8x32xf32>
    %14 = math.exp %13 : vector<8x32xf32>
    %cst = arith.constant 1.000000e+00 : f32
    %15 = vector.broadcast %cst : f32 to vector<8x32xf32>
    %16 = arith.addf %15, %14 : vector<8x32xf32>
    %17 = arith.divf %15, %16 : vector<8x32xf32>
    %18 = vector.extract_strided_slice %11 {offsets = [0, 128], sizes = [8, 32], strides = [1, 1]} : vector<8x256xf32> to vector<8x32xf32>
    %19 = math.tanh %18 : vector<8x32xf32>
    %20 = vector.extract_strided_slice %11 {offsets = [0, 192], sizes = [8, 32], strides = [1, 1]} : vector<8x256xf32> to vector<8x32xf32>
    %21 = arith.negf %20 : vector<8x32xf32>
    %22 = math.exp %21 : vector<8x32xf32>
    %cst_8 = arith.constant 1.000000e+00 : f32
    %23 = vector.broadcast %cst_8 : f32 to vector<8x32xf32>
    %24 = arith.addf %23, %22 : vector<8x32xf32>
    %25 = arith.divf %23, %24 : vector<8x32xf32>
    %26 = arith.mulf %17, %19 : vector<8x32xf32>
    %27 = math.tanh %26 : vector<8x32xf32>
    %28 = arith.mulf %25, %27 : vector<8x32xf32>
    %cst_9 = arith.constant 0.000000e+00 : f32
    %29 = vector.broadcast %cst_9 : f32 to vector<8x32xf32>
    %30 = tpu.concatenate %28, %29 in 1 : vector<8x32xf32>, vector<8x32xf32> -> vector<8x64xf32>
    %31 = tpu.concatenate %26, %29 in 1 : vector<8x32xf32>, vector<8x32xf32> -> vector<8x64xf32>
    %c0_i32 = arith.constant 0 : i32
    %c1_i32 = arith.constant 1 : i32
    %32 = arith.addi %c0_i32, %c1_i32 : i32
    %33 = arith.index_cast %32 : i32 to index
    %c0_10 = arith.constant 0 : index
    %c0_11 = arith.constant 0 : index
    %34 = vector.load %arg0[%33, %c0_10, %c0_11] : memref<9x8x1xf32, #tpu.memory_space<vmem>>, vector<1x8x1xf32>
    %35 = vector.shape_cast %34 : vector<1x8x1xf32> to vector<8x1xf32>
    %36 = vector.broadcast %35 : vector<8x1xf32> to vector<8x256xf32>
    %37 = arith.mulf %36, %3 : vector<8x256xf32>
    %38 = arith.addf %37, %6 : vector<8x256xf32>
    %cst_12 = arith.constant dense<0.000000e+00> : vector<8x256xf32>
    %39 = tpu.matmul %30, %0, %cst_12 {dimension_numbers = #tpu.dot_dimension_numbers<[1], [0], [0], [1], [0, 0, 1, 1], [], []>} : vector<8x64xf32>, vector<64x256xf32>, vector<8x256xf32> -> vector<8x256xf32>
    %40 = arith.addf %39, %38 : vector<8x256xf32>
    %41 = arith.negf %40 : vector<8x256xf32>
    %42 = math.exp %41 : vector<8x256xf32>
    %cst_13 = arith.constant 1.000000e+00 : f32
    %43 = vector.broadcast %cst_13 : f32 to vector<8x256xf32>
    %44 = arith.addf %43, %42 : vector<8x256xf32>
    %45 = arith.divf %43, %44 : vector<8x256xf32>
    %46 = math.tanh %40 : vector<8x256xf32>
    %47 = vector.extract_strided_slice %45 {offsets = [0, 0], sizes = [8, 64], strides = [1, 1]} : vector<8x256xf32> to vector<8x64xf32>
    %48 = vector.extract_strided_slice %45 {offsets = [0, 64], sizes = [8, 64], strides = [1, 1]} : vector<8x256xf32> to vector<8x64xf32>
    %49 = vector.extract_strided_slice %46 {offsets = [0, 128], sizes = [8, 64], strides = [1, 1]} : vector<8x256xf32> to vector<8x64xf32>
    %50 = vector.extract_strided_slice %45 {offsets = [0, 192], sizes = [8, 64], strides = [1, 1]} : vector<8x256xf32> to vector<8x64xf32>
    %51 = arith.mulf %48, %31 : vector<8x64xf32>
    %52 = arith.mulf %47, %49 : vector<8x64xf32>
    %53 = arith.addf %51, %52 : vector<8x64xf32>
    %54 = math.tanh %53 : vector<8x64xf32>
    %55 = arith.mulf %50, %54 : vector<8x64xf32>
    %c1_i32_14 = arith.constant 1 : i32
    %c1_i32_15 = arith.constant 1 : i32
    %56 = arith.addi %c1_i32_14, %c1_i32_15 : i32
    %57 = arith.index_cast %56 : i32 to index
    %c0_16 = arith.constant 0 : index
    %c0_17 = arith.constant 0 : index
    %58 = vector.load %arg0[%57, %c0_16, %c0_17] : memref<9x8x1xf32, #tpu.memory_space<vmem>>, vector<1x8x1xf32>
    %59 = vector.shape_cast %58 : vector<1x8x1xf32> to vector<8x1xf32>
    %60 = vector.broadcast %59 : vector<8x1xf32> to vector<8x256xf32>
    %61 = arith.mulf %60, %3 : vector<8x256xf32>
    %62 = arith.addf %61, %6 : vector<8x256xf32>
    %cst_18 = arith.constant dense<0.000000e+00> : vector<8x256xf32>
    %63 = tpu.matmul %55, %0, %cst_18 {dimension_numbers = #tpu.dot_dimension_numbers<[1], [0], [0], [1], [0, 0, 1, 1], [], []>} : vector<8x64xf32>, vector<64x256xf32>, vector<8x256xf32> -> vector<8x256xf32>
    %64 = arith.addf %63, %62 : vector<8x256xf32>
    %65 = arith.negf %64 : vector<8x256xf32>
    %66 = math.exp %65 : vector<8x256xf32>
    %cst_19 = arith.constant 1.000000e+00 : f32
    %67 = vector.broadcast %cst_19 : f32 to vector<8x256xf32>
    %68 = arith.addf %67, %66 : vector<8x256xf32>
    %69 = arith.divf %67, %68 : vector<8x256xf32>
    %70 = math.tanh %64 : vector<8x256xf32>
    %71 = vector.extract_strided_slice %69 {offsets = [0, 0], sizes = [8, 64], strides = [1, 1]} : vector<8x256xf32> to vector<8x64xf32>
    %72 = vector.extract_strided_slice %69 {offsets = [0, 64], sizes = [8, 64], strides = [1, 1]} : vector<8x256xf32> to vector<8x64xf32>
    %73 = vector.extract_strided_slice %70 {offsets = [0, 128], sizes = [8, 64], strides = [1, 1]} : vector<8x256xf32> to vector<8x64xf32>
    %74 = vector.extract_strided_slice %69 {offsets = [0, 192], sizes = [8, 64], strides = [1, 1]} : vector<8x256xf32> to vector<8x64xf32>
    %75 = arith.mulf %72, %53 : vector<8x64xf32>
    %76 = arith.mulf %71, %73 : vector<8x64xf32>
    %77 = arith.addf %75, %76 : vector<8x64xf32>
    %78 = math.tanh %77 : vector<8x64xf32>
    %79 = arith.mulf %74, %78 : vector<8x64xf32>
    %c2_i32 = arith.constant 2 : i32
    %c1_i32_20 = arith.constant 1 : i32
    %80 = arith.addi %c2_i32, %c1_i32_20 : i32
    %81 = arith.index_cast %80 : i32 to index
    %c0_21 = arith.constant 0 : index
    %c0_22 = arith.constant 0 : index
    %82 = vector.load %arg0[%81, %c0_21, %c0_22] : memref<9x8x1xf32, #tpu.memory_space<vmem>>, vector<1x8x1xf32>
    %83 = vector.shape_cast %82 : vector<1x8x1xf32> to vector<8x1xf32>
    %84 = vector.broadcast %83 : vector<8x1xf32> to vector<8x256xf32>
    %85 = arith.mulf %84, %3 : vector<8x256xf32>
    %86 = arith.addf %85, %6 : vector<8x256xf32>
    %cst_23 = arith.constant dense<0.000000e+00> : vector<8x256xf32>
    %87 = tpu.matmul %79, %0, %cst_23 {dimension_numbers = #tpu.dot_dimension_numbers<[1], [0], [0], [1], [0, 0, 1, 1], [], []>} : vector<8x64xf32>, vector<64x256xf32>, vector<8x256xf32> -> vector<8x256xf32>
    %88 = arith.addf %87, %86 : vector<8x256xf32>
    %89 = arith.negf %88 : vector<8x256xf32>
    %90 = math.exp %89 : vector<8x256xf32>
    %cst_24 = arith.constant 1.000000e+00 : f32
    %91 = vector.broadcast %cst_24 : f32 to vector<8x256xf32>
    %92 = arith.addf %91, %90 : vector<8x256xf32>
    %93 = arith.divf %91, %92 : vector<8x256xf32>
    %94 = math.tanh %88 : vector<8x256xf32>
    %95 = vector.extract_strided_slice %93 {offsets = [0, 0], sizes = [8, 64], strides = [1, 1]} : vector<8x256xf32> to vector<8x64xf32>
    %96 = vector.extract_strided_slice %93 {offsets = [0, 64], sizes = [8, 64], strides = [1, 1]} : vector<8x256xf32> to vector<8x64xf32>
    %97 = vector.extract_strided_slice %94 {offsets = [0, 128], sizes = [8, 64], strides = [1, 1]} : vector<8x256xf32> to vector<8x64xf32>
    %98 = vector.extract_strided_slice %93 {offsets = [0, 192], sizes = [8, 64], strides = [1, 1]} : vector<8x256xf32> to vector<8x64xf32>
    %99 = arith.mulf %96, %77 : vector<8x64xf32>
    %100 = arith.mulf %95, %97 : vector<8x64xf32>
    %101 = arith.addf %99, %100 : vector<8x64xf32>
    %102 = math.tanh %101 : vector<8x64xf32>
    %103 = arith.mulf %98, %102 : vector<8x64xf32>
    %c3_i32 = arith.constant 3 : i32
    %c1_i32_25 = arith.constant 1 : i32
    %104 = arith.addi %c3_i32, %c1_i32_25 : i32
    %105 = arith.index_cast %104 : i32 to index
    %c0_26 = arith.constant 0 : index
    %c0_27 = arith.constant 0 : index
    %106 = vector.load %arg0[%105, %c0_26, %c0_27] : memref<9x8x1xf32, #tpu.memory_space<vmem>>, vector<1x8x1xf32>
    %107 = vector.shape_cast %106 : vector<1x8x1xf32> to vector<8x1xf32>
    %108 = vector.broadcast %107 : vector<8x1xf32> to vector<8x256xf32>
    %109 = arith.mulf %108, %3 : vector<8x256xf32>
    %110 = arith.addf %109, %6 : vector<8x256xf32>
    %cst_28 = arith.constant dense<0.000000e+00> : vector<8x256xf32>
    %111 = tpu.matmul %103, %0, %cst_28 {dimension_numbers = #tpu.dot_dimension_numbers<[1], [0], [0], [1], [0, 0, 1, 1], [], []>} : vector<8x64xf32>, vector<64x256xf32>, vector<8x256xf32> -> vector<8x256xf32>
    %112 = arith.addf %111, %110 : vector<8x256xf32>
    %113 = arith.negf %112 : vector<8x256xf32>
    %114 = math.exp %113 : vector<8x256xf32>
    %cst_29 = arith.constant 1.000000e+00 : f32
    %115 = vector.broadcast %cst_29 : f32 to vector<8x256xf32>
    %116 = arith.addf %115, %114 : vector<8x256xf32>
    %117 = arith.divf %115, %116 : vector<8x256xf32>
    %118 = math.tanh %112 : vector<8x256xf32>
    %119 = vector.extract_strided_slice %117 {offsets = [0, 0], sizes = [8, 64], strides = [1, 1]} : vector<8x256xf32> to vector<8x64xf32>
    %120 = vector.extract_strided_slice %117 {offsets = [0, 64], sizes = [8, 64], strides = [1, 1]} : vector<8x256xf32> to vector<8x64xf32>
    %121 = vector.extract_strided_slice %118 {offsets = [0, 128], sizes = [8, 64], strides = [1, 1]} : vector<8x256xf32> to vector<8x64xf32>
    %122 = vector.extract_strided_slice %117 {offsets = [0, 192], sizes = [8, 64], strides = [1, 1]} : vector<8x256xf32> to vector<8x64xf32>
    %123 = arith.mulf %120, %101 : vector<8x64xf32>
    %124 = arith.mulf %119, %121 : vector<8x64xf32>
    %125 = arith.addf %123, %124 : vector<8x64xf32>
    %126 = math.tanh %125 : vector<8x64xf32>
    %127 = arith.mulf %122, %126 : vector<8x64xf32>
    %c4_i32 = arith.constant 4 : i32
    %c1_i32_30 = arith.constant 1 : i32
    %128 = arith.addi %c4_i32, %c1_i32_30 : i32
    %129 = arith.index_cast %128 : i32 to index
    %c0_31 = arith.constant 0 : index
    %c0_32 = arith.constant 0 : index
    %130 = vector.load %arg0[%129, %c0_31, %c0_32] : memref<9x8x1xf32, #tpu.memory_space<vmem>>, vector<1x8x1xf32>
    %131 = vector.shape_cast %130 : vector<1x8x1xf32> to vector<8x1xf32>
    %132 = vector.broadcast %131 : vector<8x1xf32> to vector<8x256xf32>
    %133 = arith.mulf %132, %3 : vector<8x256xf32>
    %134 = arith.addf %133, %6 : vector<8x256xf32>
    %cst_33 = arith.constant dense<0.000000e+00> : vector<8x256xf32>
    %135 = tpu.matmul %127, %0, %cst_33 {dimension_numbers = #tpu.dot_dimension_numbers<[1], [0], [0], [1], [0, 0, 1, 1], [], []>} : vector<8x64xf32>, vector<64x256xf32>, vector<8x256xf32> -> vector<8x256xf32>
    %136 = arith.addf %135, %134 : vector<8x256xf32>
    %137 = arith.negf %136 : vector<8x256xf32>
    %138 = math.exp %137 : vector<8x256xf32>
    %cst_34 = arith.constant 1.000000e+00 : f32
    %139 = vector.broadcast %cst_34 : f32 to vector<8x256xf32>
    %140 = arith.addf %139, %138 : vector<8x256xf32>
    %141 = arith.divf %139, %140 : vector<8x256xf32>
    %142 = math.tanh %136 : vector<8x256xf32>
    %143 = vector.extract_strided_slice %141 {offsets = [0, 0], sizes = [8, 64], strides = [1, 1]} : vector<8x256xf32> to vector<8x64xf32>
    %144 = vector.extract_strided_slice %141 {offsets = [0, 64], sizes = [8, 64], strides = [1, 1]} : vector<8x256xf32> to vector<8x64xf32>
    %145 = vector.extract_strided_slice %142 {offsets = [0, 128], sizes = [8, 64], strides = [1, 1]} : vector<8x256xf32> to vector<8x64xf32>
    %146 = vector.extract_strided_slice %141 {offsets = [0, 192], sizes = [8, 64], strides = [1, 1]} : vector<8x256xf32> to vector<8x64xf32>
    %147 = arith.mulf %144, %125 : vector<8x64xf32>
    %148 = arith.mulf %143, %145 : vector<8x64xf32>
    %149 = arith.addf %147, %148 : vector<8x64xf32>
    %150 = math.tanh %149 : vector<8x64xf32>
    %151 = arith.mulf %146, %150 : vector<8x64xf32>
    %c5_i32 = arith.constant 5 : i32
    %c1_i32_35 = arith.constant 1 : i32
    %152 = arith.addi %c5_i32, %c1_i32_35 : i32
    %153 = arith.index_cast %152 : i32 to index
    %c0_36 = arith.constant 0 : index
    %c0_37 = arith.constant 0 : index
    %154 = vector.load %arg0[%153, %c0_36, %c0_37] : memref<9x8x1xf32, #tpu.memory_space<vmem>>, vector<1x8x1xf32>
    %155 = vector.shape_cast %154 : vector<1x8x1xf32> to vector<8x1xf32>
    %156 = vector.broadcast %155 : vector<8x1xf32> to vector<8x256xf32>
    %157 = arith.mulf %156, %3 : vector<8x256xf32>
    %158 = arith.addf %157, %6 : vector<8x256xf32>
    %cst_38 = arith.constant dense<0.000000e+00> : vector<8x256xf32>
    %159 = tpu.matmul %151, %0, %cst_38 {dimension_numbers = #tpu.dot_dimension_numbers<[1], [0], [0], [1], [0, 0, 1, 1], [], []>} : vector<8x64xf32>, vector<64x256xf32>, vector<8x256xf32> -> vector<8x256xf32>
    %160 = arith.addf %159, %158 : vector<8x256xf32>
    %161 = arith.negf %160 : vector<8x256xf32>
    %162 = math.exp %161 : vector<8x256xf32>
    %cst_39 = arith.constant 1.000000e+00 : f32
    %163 = vector.broadcast %cst_39 : f32 to vector<8x256xf32>
    %164 = arith.addf %163, %162 : vector<8x256xf32>
    %165 = arith.divf %163, %164 : vector<8x256xf32>
    %166 = math.tanh %160 : vector<8x256xf32>
    %167 = vector.extract_strided_slice %165 {offsets = [0, 0], sizes = [8, 64], strides = [1, 1]} : vector<8x256xf32> to vector<8x64xf32>
    %168 = vector.extract_strided_slice %165 {offsets = [0, 64], sizes = [8, 64], strides = [1, 1]} : vector<8x256xf32> to vector<8x64xf32>
    %169 = vector.extract_strided_slice %166 {offsets = [0, 128], sizes = [8, 64], strides = [1, 1]} : vector<8x256xf32> to vector<8x64xf32>
    %170 = vector.extract_strided_slice %165 {offsets = [0, 192], sizes = [8, 64], strides = [1, 1]} : vector<8x256xf32> to vector<8x64xf32>
    %171 = arith.mulf %168, %149 : vector<8x64xf32>
    %172 = arith.mulf %167, %169 : vector<8x64xf32>
    %173 = arith.addf %171, %172 : vector<8x64xf32>
    %174 = math.tanh %173 : vector<8x64xf32>
    %175 = arith.mulf %170, %174 : vector<8x64xf32>
    %c6_i32 = arith.constant 6 : i32
    %c1_i32_40 = arith.constant 1 : i32
    %176 = arith.addi %c6_i32, %c1_i32_40 : i32
    %177 = arith.index_cast %176 : i32 to index
    %c0_41 = arith.constant 0 : index
    %c0_42 = arith.constant 0 : index
    %178 = vector.load %arg0[%177, %c0_41, %c0_42] : memref<9x8x1xf32, #tpu.memory_space<vmem>>, vector<1x8x1xf32>
    %179 = vector.shape_cast %178 : vector<1x8x1xf32> to vector<8x1xf32>
    %180 = vector.broadcast %179 : vector<8x1xf32> to vector<8x256xf32>
    %181 = arith.mulf %180, %3 : vector<8x256xf32>
    %182 = arith.addf %181, %6 : vector<8x256xf32>
    %cst_43 = arith.constant dense<0.000000e+00> : vector<8x256xf32>
    %183 = tpu.matmul %175, %0, %cst_43 {dimension_numbers = #tpu.dot_dimension_numbers<[1], [0], [0], [1], [0, 0, 1, 1], [], []>} : vector<8x64xf32>, vector<64x256xf32>, vector<8x256xf32> -> vector<8x256xf32>
    %184 = arith.addf %183, %182 : vector<8x256xf32>
    %185 = arith.negf %184 : vector<8x256xf32>
    %186 = math.exp %185 : vector<8x256xf32>
    %cst_44 = arith.constant 1.000000e+00 : f32
    %187 = vector.broadcast %cst_44 : f32 to vector<8x256xf32>
    %188 = arith.addf %187, %186 : vector<8x256xf32>
    %189 = arith.divf %187, %188 : vector<8x256xf32>
    %190 = math.tanh %184 : vector<8x256xf32>
    %191 = vector.extract_strided_slice %189 {offsets = [0, 0], sizes = [8, 64], strides = [1, 1]} : vector<8x256xf32> to vector<8x64xf32>
    %192 = vector.extract_strided_slice %189 {offsets = [0, 64], sizes = [8, 64], strides = [1, 1]} : vector<8x256xf32> to vector<8x64xf32>
    %193 = vector.extract_strided_slice %190 {offsets = [0, 128], sizes = [8, 64], strides = [1, 1]} : vector<8x256xf32> to vector<8x64xf32>
    %194 = vector.extract_strided_slice %189 {offsets = [0, 192], sizes = [8, 64], strides = [1, 1]} : vector<8x256xf32> to vector<8x64xf32>
    %195 = arith.mulf %192, %173 : vector<8x64xf32>
    %196 = arith.mulf %191, %193 : vector<8x64xf32>
    %197 = arith.addf %195, %196 : vector<8x64xf32>
    %198 = math.tanh %197 : vector<8x64xf32>
    %199 = arith.mulf %194, %198 : vector<8x64xf32>
    %c7_i32 = arith.constant 7 : i32
    %c1_i32_45 = arith.constant 1 : i32
    %200 = arith.addi %c7_i32, %c1_i32_45 : i32
    %201 = arith.index_cast %200 : i32 to index
    %c0_46 = arith.constant 0 : index
    %c0_47 = arith.constant 0 : index
    %202 = vector.load %arg0[%201, %c0_46, %c0_47] : memref<9x8x1xf32, #tpu.memory_space<vmem>>, vector<1x8x1xf32>
    %203 = vector.shape_cast %202 : vector<1x8x1xf32> to vector<8x1xf32>
    %204 = vector.broadcast %203 : vector<8x1xf32> to vector<8x256xf32>
    %205 = arith.mulf %204, %3 : vector<8x256xf32>
    %206 = arith.addf %205, %6 : vector<8x256xf32>
    %cst_48 = arith.constant dense<0.000000e+00> : vector<8x256xf32>
    %207 = tpu.matmul %199, %0, %cst_48 {dimension_numbers = #tpu.dot_dimension_numbers<[1], [0], [0], [1], [0, 0, 1, 1], [], []>} : vector<8x64xf32>, vector<64x256xf32>, vector<8x256xf32> -> vector<8x256xf32>
    %208 = arith.addf %207, %206 : vector<8x256xf32>
    %209 = arith.negf %208 : vector<8x256xf32>
    %210 = math.exp %209 : vector<8x256xf32>
    %cst_49 = arith.constant 1.000000e+00 : f32
    %211 = vector.broadcast %cst_49 : f32 to vector<8x256xf32>
    %212 = arith.addf %211, %210 : vector<8x256xf32>
    %213 = arith.divf %211, %212 : vector<8x256xf32>
    %214 = math.tanh %208 : vector<8x256xf32>
    %215 = vector.extract_strided_slice %213 {offsets = [0, 0], sizes = [8, 64], strides = [1, 1]} : vector<8x256xf32> to vector<8x64xf32>
    %216 = vector.extract_strided_slice %213 {offsets = [0, 64], sizes = [8, 64], strides = [1, 1]} : vector<8x256xf32> to vector<8x64xf32>
    %217 = vector.extract_strided_slice %214 {offsets = [0, 128], sizes = [8, 64], strides = [1, 1]} : vector<8x256xf32> to vector<8x64xf32>
    %218 = vector.extract_strided_slice %213 {offsets = [0, 192], sizes = [8, 64], strides = [1, 1]} : vector<8x256xf32> to vector<8x64xf32>
    %219 = arith.mulf %216, %197 : vector<8x64xf32>
    %220 = arith.mulf %215, %217 : vector<8x64xf32>
    %221 = arith.addf %219, %220 : vector<8x64xf32>
    %222 = math.tanh %221 : vector<8x64xf32>
    %223 = arith.mulf %218, %222 : vector<8x64xf32>
    %c8_i32 = arith.constant 8 : i32
    %224 = vector.extract_strided_slice %223 {offsets = [0, 32], sizes = [8, 32], strides = [1, 1]} : vector<8x64xf32> to vector<8x32xf32>
    %c0_50 = arith.constant 0 : index
    %c0_51 = arith.constant 0 : index
    %225 = vector.load %arg4[%c0_50, %c0_51] : memref<1x32xf32, #tpu.memory_space<vmem>>, vector<1x32xf32>
    %226 = vector.broadcast %225 : vector<1x32xf32> to vector<8x32xf32>
    %227 = arith.mulf %224, %226 : vector<8x32xf32>
    %cst_52 = arith.constant dense<0.000000e+00> : vector<8xf32>
    %228 = vector.multi_reduction <add>, %227, %cst_52 [1] : vector<8x32xf32> to vector<8xf32>
    %229 = vector.shape_cast %228 : vector<8xf32> to vector<8x1xf32>
    %c0_53 = arith.constant 0 : index
    %c0_54 = arith.constant 0 : index
    %230 = vector.load %arg5[%c0_53, %c0_54] : memref<1x1xf32, #tpu.memory_space<vmem>>, vector<1x1xf32>
    %231 = vector.broadcast %230 : vector<1x1xf32> to vector<8x1xf32>
    %232 = arith.addf %229, %231 : vector<8x1xf32>
    %233 = vector.shape_cast %232 : vector<8x1xf32> to vector<8x1xf32>
    %234 = vector.broadcast %233 : vector<8x1xf32> to vector<8x128xf32>
    %c0_55 = arith.constant 0 : index
    %c0_56 = arith.constant 0 : index
    %235 = vector.load %arg6[%c0_55, %c0_56] : memref<8x128xf32, #tpu.memory_space<vmem>>, vector<8x128xf32>
    tpu.vector_store %arg6[%c0_55, %c0_56], %234 {strides = array<i32>} : memref<8x128xf32, #tpu.memory_space<vmem>>, vector<8x128xf32>,
    return
  }
}

</mosaic_0001>

<bundles_post_ra>
// kernel: _lstm_forward_impl.1
= control target key start
LH: loop header
LB: loop body
LE: loop exit
PB: predicated region body
PF: predicated region fallthrough
CT: control target
= control target key end

     0   :  { %s1532_s0 = inlined_call_operand.vmem [shape: f32[9,8,1], index: 0, kind: input, shape index: {}]   ;;  %s1533_s1 = inlined_call_operand.hbm [shape: f32[64,256], index: 1, kind: input, shape index: {}]   ;;  %s1534_s2 = inlined_call_operand.vmem [shape: f32[1,256], index: 2, kind: input, shape index: {}]   ;;  %s1535_s3 = inlined_call_operand.vmem [shape: f32[1,256], index: 3, kind: input, shape index: {}]   ;;  %s1536_s4 = inlined_call_operand.vmem [shape: f32[1,32], index: 4, kind: input, shape index: {}]   ;;  %s1537_s5 = inlined_call_operand.<no memory space> [shape: f32[1,1], index: 5, kind: input, shape index: {}]   ;;  %s1538_s6 = inlined_call_operand.vmem [shape: f32[8,128], index: 6, kind: output, shape index: {}]  }
   0x1   :  { %v11_v0 = vstv %s1537_s5 }
   0x2   :  { %12 = vst [vmem:[#allocation2] sm:$0x1] %v11_v0 }
   0x3   :  { %13 = vsyncpa [#allocation4], 0  ;;  %s1203_s23 = smov [#allocation3]  }
   0x4   :  { %s21_s24 = sshll.u32 %s1203_s23, 4  ;;  %s22_s24 = int_to_ptr.vmem [resolvable:$true] %s21_s24 }
   0x5   :  { %s1189_s25 = scalar_lea.vmem %s22_s24, 2048  ;;  %p1194_p1 = scmp.lt.s32.totalorder %s22_s24, %s22_s24 }
   0x6   :  { %p1190_p0 = scmp.ne.s32.totalorder %s22_s24, %s1189_s25  ;;  %p1195_p2 = scmp.lt.s32.totalorder %s1189_s25, %s1189_s25 }
   0x8   :  { %p1196_p3 = por %p1195_p2, %p1194_p1 }
   0xa   :  { %p1197_p4 = pnand %p1196_p3, %p1190_p0 }
   0xc   :  { %1200 = shalt.err (!%p1197_p4)
}
   0xd   :  { %s1204_s26 = smov 256   ;;  %s1205_s27 = smov 16  }
   0xe   :  { %27 = dma.hbm_to_vmem [thread:$0]  %s1533_s1, 2048, %s22_s24, [#allocation4], %s1204_s26, %s1204_s26, %s1205_s27  }
   0xf   :  { %1201 = dma.done.wait [#allocation4], 2048  }
  0x10   :  { %1202 = vsyncadd [#allocation4], 4294965248  ;;  %v1206_v1 = vmov 0   ;;  %v79_v2 = vld [vmem:[%s1532_s0] sm:$0xff]  ;;  %v57_v3 = vlaneseq  ;;  %v1275_v25 = vld [vmem:[#allocation3 + $0x70] sm:$0xff]  ;;  %s1207_s1 = smov 64  }
  0x11   :  { %1071 = vset.pattern.permute.xlu0 %v1206_v1  ;;  %1072 = vset.pattern.permute.xlu1 %v1206_v1  ;;  %v55_v6 = vld [vmem:[%s1534_s2] sm:$0x3]  ;;  %v1277_v26 = vld [vmem:[#allocation3 + $0x68] sm:$0xff]  ;;  %v1288_v29 = vld [vmem:[#allocation3 + $0x50] sm:$0xff]  ;;  %vm113_vm0 = vcmask 261120   ;;  %v1208_v45 = vmov 0.0  }
  0x12   :  { %82 = vperm.xlu0 %1071, %v79_v2   ;;  %v58_v4 = vshrl.u32 %v57_v3, 7  ;;  %v67_v7 = vld [vmem:[%s1535_s3] sm:$0x3]  ;;  %v1292_v30 = vld [vmem:[#allocation3 + $0x48] sm:$0xff]  ;;  %v1304_v33 = vld [vmem:[#allocation3 + $0x30] sm:$0xff]  ;;  %195 = vmatprep.mubr.f32.mxu0 %v1208_v45  ;;  %vm127_vm1 = vcmask 523264  }
  0x13   :  { %v1273_v24 = vld [vmem:[#allocation3 + $0x78] sm:$0xff]  ;;  %v1280_v27 = vld [vmem:[#allocation3 + $0x60] sm:$0xff]  ;;  %v1308_v34 = vld [vmem:[#allocation3 + $0x28] sm:$0xff]  ;;  %308 = vmatprep.mubr.f32.mxu1 %v1208_v45  ;;  %s1209_s26 = smov 96  }
  0x14   :  { %v59_v5 = vsub.s32 0, %v58_v4  ;;  %v63_v14 = vsub.s32 1, %v58_v4  ;;  %147 = vmatprep.subr.mxu0 %v1273_v24  ;;  %260 = vmatprep.subr.mxu1 %v1273_v24  ;;  %v1284_v28 = vld [vmem:[#allocation3 + $0x58] sm:$0xff]  ;;  %v1296_v31 = vld [vmem:[#allocation3 + $0x40] sm:$0xff]  ;;  %v1320_v38 = vld [vmem:[#allocation3 + $0x10] sm:$0xff] }
  0x15   :  { %148 = vmatpush1.msra.mxu0 %v1275_v25  ;;  %261 = vmatpush1.msra.mxu1 %v1275_v25  ;;  %v1300_v32 = vld [vmem:[#allocation3 + $0x38] sm:$0xff]  ;;  %v1312_v36 = vld [vmem:[#allocation3 + $0x20] sm:$0xff]  ;;  %v1332_v43 = vld [vmem:[#allocation3 + $0x8] sm:$0xff] }
  0x16   :  { %v1261_v8 = vrot.slane %v55_v6, %v59_v5  ;;  %v1263_v9 = vrot.slane %v67_v7, %v59_v5  ;;  %v1267_v15 = vrot.slane %v55_v6, %v63_v14  ;;  %v1269_v16 = vrot.slane %v67_v7, %v63_v14  ;;  %149 = vmatprep.subr.mxu0 %v1277_v26  ;;  %v1317_v37 = vld [vmem:[#allocation3 + $0x18] sm:$0xff]  ;;  %v1335_v44 = vld [vmem:[#allocation3] sm:$0xff]  ;;  %v1033_v3 = vld [vmem:[%s1532_s0 + $0x10] sm:$0xff] }
  0x17   :  { %262 = vmatprep.subr.mxu1 %v1277_v26  ;;  %150 = vmatpush1.msra.mxu0 %v1280_v27  ;;  %v1029_v49 = vld [vmem:[%s1532_s0 + $0x8] sm:$0xff] }
  0x18   :  { %263 = vmatpush1.msra.mxu1 %v1280_v27  ;;  %151 = vmatprep.subr.mxu0 %v1284_v28 }
  0x19   :  { %264 = vmatprep.subr.mxu1 %v1284_v28  ;;  %152 = vmatpush1.msra.mxu0 %v1288_v29 }
  0x1a   :  { %265 = vmatpush1.msra.mxu1 %v1288_v29  ;;  %153 = vmatprep.subr.mxu0 %v1292_v30 }
  0x1b   :  { %266 = vmatprep.subr.mxu1 %v1292_v30  ;;  %154 = vmatpush1.msra.mxu0 %v1296_v31 }
  0x1c   :  { %267 = vmatpush1.msra.mxu1 %v1296_v31  ;;  %155 = vmatprep.subr.mxu0 %v1300_v32 }
  0x1d   :  { %268 = vmatprep.subr.mxu1 %v1300_v32  ;;  %156 = vmatpush1.msra.mxu0 %v1304_v33 }
  0x1e   :  { %157 = vmatprep.subr.mxu0 %v1308_v34  ;;  %269 = vmatpush1.msra.mxu1 %v1304_v33 }
  0x1f   :  { %158 = vmatpush1.msra.mxu0 %v1312_v36  ;;  %270 = vmatprep.subr.mxu1 %v1308_v34 }
  0x20   :  { %159 = vmatprep.subr.mxu0 %v1317_v37  ;;  %271 = vmatpush1.msra.mxu1 %v1312_v36 }
  0x21   :  { %160 = vmatpush1.msra.mxu0 %v1320_v38  ;;  %272 = vmatprep.subr.mxu1 %v1317_v37 }
  0x22   :  { %273 = vmatpush1.msra.mxu1 %v1320_v38  ;;  %161 = vmatprep.subr.mxu0 %v1332_v43 }
  0x23   :  { %274 = vmatprep.subr.mxu1 %v1332_v43  ;;  %162 = vmatpush1.msra.mxu0 %v1335_v44 }
  0x24   :  { %275 = vmatpush1.msra.mxu1 %v1335_v44  ;;  %369 = vmatprep.subr.mxu0 %v1273_v24 }
  0x25   :  { %478 = vmatprep.subr.mxu1 %v1273_v24 }
  0x8d   :  { %v83_v10 = vpop.permute.xlu0 %82 }
  0x8e   :  { %v85_v11 = vmul.f32 %v83_v10, %v1261_v8  ;;  %v86_v17 = vmul.f32 %v83_v10, %v1267_v15 }
  0x90   :  { %v87_v12 = vadd.f32 %v85_v11, %v1263_v9  ;;  %v88_v18 = vadd.f32 %v86_v17, %v1269_v16 }
  0x92   :  { %v1027_v13 = vmul.f32 -1.442695, %v87_v12  ;;  %v1028_v40 = vmul.f32 -1.442695, %v88_v18 }
  0x94   :  { %1073 = vpow2.f32 %v1027_v13 }
  0x95   :  { %1075 = vtanh.f32 %v88_v18 }
  0xa1   :  { %v1074_v19 = vpop.eup %1073 }
  0xa2   :  { %v92_v20 = vadd.f32 1.0, %v1074_v19  ;;  %v1076_v21 = vpop.eup %1075 }
  0xa4   :  { %1077 = vrcp.f32 %v92_v20 }
  0xb1   :  { %v1078_v22 = vpop.eup %1077 }
  0xb2   :  { %v102_v23 = vmul.f32 %v1078_v22, %v1076_v21 }
  0xb4   :  { %1079 = vtanh.f32 %v102_v23  ;;  %v115_v39 = vsel %vm113_vm0, %v102_v23, 0.0 }
  0xb5   :  { %1081 = vpow2.f32 %v1028_v40 }
  0xc1   :  { %v1080_v35 = vpop.eup %1079 }
  0xc2   :  { %105 = vrot.lane.b32.xlu0 %v1080_v35, %s1207_s1  ;;  %v1082_v41 = vpop.eup %1081 }
  0xc3   :  { %v99_v42 = vadd.f32 1.0, %v1082_v41 }
  0xc5   :  { %1083 = vrcp.f32 %v99_v42 }
  0xc6   :  { %216 = vrot.lane.b32.xlu0 %v115_v39, %s1207_s1 }
  0xd2   :  { %v1084_v46 = vpop.eup %1083 }
 0x134   :  { %v106_v47 = vpop.permute.xlu0 %105 }
 0x135   :  { %v108_v48 = vmul.f32 %v1084_v46, %v106_v47 }
 0x137   :  { %110 = vrot.lane.b32.xlu1 %v108_v48, %s1207_s1 }
 0x138   :  { %v217_v6 = vpop.permute.xlu0 %216 }
 0x13b   :  { %120 = vperm.xlu1 %1072, %v1029_v49  }
 0x1a9   :  { %v111_v50 = vpop.permute.xlu1 %110 }
 0x1aa   :  { %v114_v51 = vsel %vm113_vm0, %v111_v50, 0.0 }
 0x1ab   :  { %1030 = vmatmul.mubr.msk.f32.vlgmr.msra.gmra.mxu0 %vm127_vm1, %v114_v51  ;;  %v1037_v51 = vld [vmem:[%s1532_s0 + $0x18] sm:$0xff] }
 0x1ac   :  { %370 = vmatpush1.msra.mxu0 %v1275_v25  ;;  %417 = vmatprep.mubr.f32.mxu0 %v1208_v45 }
 0x1ad   :  { %371 = vmatprep.subr.mxu0 %v1277_v26 }
 0x1ae   :  { %372 = vmatpush1.msra.mxu0 %v1280_v27 }
 0x1af   :  { %373 = vmatprep.subr.mxu0 %v1284_v28 }
 0x1b0   :  { %374 = vmatpush1.msra.mxu0 %v1288_v29 }
 0x1b1   :  { %375 = vmatprep.subr.mxu0 %v1292_v30 }
 0x1b2   :  { %376 = vmatpush1.msra.mxu0 %v1296_v31 }
 0x1b3   :  { %377 = vmatprep.subr.mxu0 %v1300_v32 }
 0x1b4   :  { %378 = vmatpush1.msra.mxu0 %v1304_v33 }
 0x1b5   :  { %379 = vmatprep.subr.mxu0 %v1308_v34 }
 0x1b6   :  { %380 = vmatpush1.msra.mxu0 %v1312_v36  ;;  %v121_v52 = vpop.permute.xlu1 %120 }
 0x1b7   :  { %381 = vmatprep.subr.mxu0 %v1317_v37  ;;  %v123_v53 = vmul.f32 %v121_v52, %v1261_v8  ;;  %v124_v58 = vmul.f32 %v121_v52, %v1267_v15 }
 0x1b8   :  { %382 = vmatpush1.msra.mxu0 %v1320_v38 }
 0x1b9   :  { %383 = vmatprep.subr.mxu0 %v1332_v43  ;;  %v125_v54 = vadd.f32 %v123_v53, %v1263_v9  ;;  %v126_v60 = vadd.f32 %v124_v58, %v1269_v16 }
 0x1ba   :  { %384 = vmatpush1.msra.mxu0 %v1335_v44 }
 0x1bb   :  { %587 = vmatprep.subr.mxu0 %v1273_v24 }
 0x26b   :  { %v197_v55 = vpop.f32.mrf.mxu0 }
 0x26c   :  { %v198_v56 = vadd.f32 %v197_v55, %v125_v54 }
 0x26d   :  { %v199_v59 = vpop.f32.mrf.mxu0 }
 0x26e   :  { %v1031_v57 = vmul.f32 -1.442695, %v198_v56  ;;  %v200_v61 = vadd.f32 %v199_v59, %v126_v60 }
 0x270   :  { %1085 = vpow2.f32 %v1031_v57  ;;  %v1032_v4 = vmul.f32 -1.442695, %v200_v61 }
 0x271   :  { %1087 = vtanh.f32 %v200_v61 }
 0x27d   :  { %v1086_v62 = vpop.eup %1085 }
 0x27e   :  { %v208_v63 = vadd.f32 1.0, %v1086_v62  ;;  %v1088_v0 = vpop.eup %1087 }
 0x280   :  { %1089 = vrcp.f32 %v208_v63 }
 0x281   :  { %1091 = vpow2.f32 %v1032_v4 }
 0x28d   :  { %v1090_v1 = vpop.eup %1089 }
 0x28e   :  { %v220_v2 = vmul.f32 %v1090_v1, %v1088_v0  ;;  %v1092_v5 = vpop.eup %1091  ;;  %v219_v10 = vmul.f32 %v1090_v1, %v217_v6 }
 0x28f   :  { %v209_v7 = vadd.f32 1.0, %v1092_v5 }
 0x290   :  { %222 = vrot.lane.b32.xlu1 %v220_v2, %s1207_s1 }
 0x291   :  { %1093 = vrcp.f32 %v209_v7 }
 0x294   :  { %232 = vperm.xlu1 %1072, %v1033_v3  }
 0x29e   :  { %v1094_v13 = vpop.eup %1093 }
 0x302   :  { %v223_v11 = vpop.permute.xlu1 %222 }
 0x303   :  { %v225_v12 = vadd.f32 %v223_v11, %v219_v10 }
 0x305   :  { %1095 = vtanh.f32 %v225_v12 }
 0x30f   :  { %v233_v19 = vpop.permute.xlu1 %232 }
 0x310   :  { %v235_v20 = vmul.f32 %v233_v19, %v1261_v8  ;;  %v236_v39 = vmul.f32 %v233_v19, %v1267_v15 }
 0x312   :  { %v1096_v14 = vpop.eup %1095  ;;  %v237_v21 = vadd.f32 %v235_v20, %v1263_v9  ;;  %v238_v41 = vadd.f32 %v236_v39, %v1269_v16 }
 0x313   :  { %v227_v17 = vmul.f32 %v1096_v14, %v1094_v13 }
 0x315   :  { %240 = vrot.lane.b32.xlu0 %v227_v17, %s1207_s1  ;;  %v1041_v17 = vld [vmem:[%s1532_s0 + $0x20] sm:$0xff] }
 0x387   :  { %v241_v18 = vpop.permute.xlu0 %240 }
 0x388   :  { %1034 = vmatmul.mubr.msk.f32.vlgmr.msra.gmra.mxu1 %vm127_vm1, %v241_v18 }
 0x389   :  { %479 = vmatpush1.msra.mxu1 %v1275_v25  ;;  %526 = vmatprep.mubr.f32.mxu1 %v1208_v45 }
 0x38a   :  { %480 = vmatprep.subr.mxu1 %v1277_v26 }
 0x38b   :  { %481 = vmatpush1.msra.mxu1 %v1280_v27 }
 0x38c   :  { %482 = vmatprep.subr.mxu1 %v1284_v28 }
 0x38d   :  { %483 = vmatpush1.msra.mxu1 %v1288_v29 }
 0x38e   :  { %484 = vmatprep.subr.mxu1 %v1292_v30 }
 0x38f   :  { %485 = vmatpush1.msra.mxu1 %v1296_v31 }
 0x390   :  { %486 = vmatprep.subr.mxu1 %v1300_v32 }
 0x391   :  { %487 = vmatpush1.msra.mxu1 %v1304_v33 }
 0x392   :  { %488 = vmatprep.subr.mxu1 %v1308_v34 }
 0x393   :  { %489 = vmatpush1.msra.mxu1 %v1312_v36 }
 0x394   :  { %490 = vmatprep.subr.mxu1 %v1317_v37 }
 0x395   :  { %491 = vmatpush1.msra.mxu1 %v1320_v38 }
 0x396   :  { %492 = vmatprep.subr.mxu1 %v1332_v43 }
 0x397   :  { %493 = vmatpush1.msra.mxu1 %v1335_v44 }
 0x398   :  { %696 = vmatprep.subr.mxu1 %v1273_v24 }
 0x448   :  { %v310_v22 = vpop.f32.mrf.mxu1 }
 0x449   :  { %v311_v23 = vadd.f32 %v310_v22, %v237_v21 }
 0x44a   :  { %v312_v40 = vpop.f32.mrf.mxu1 }
 0x44b   :  { %v1035_v35 = vmul.f32 -1.442695, %v311_v23  ;;  %v313_v42 = vadd.f32 %v312_v40, %v238_v41 }
 0x44d   :  { %1097 = vpow2.f32 %v1035_v35  ;;  %v1036_v52 = vmul.f32 -1.442695, %v313_v42 }
 0x44e   :  { %1099 = vtanh.f32 %v313_v42 }
 0x45a   :  { %v1098_v46 = vpop.eup %1097 }
 0x45b   :  { %v321_v47 = vadd.f32 1.0, %v1098_v46  ;;  %v1100_v48 = vpop.eup %1099 }
 0x45d   :  { %1101 = vrcp.f32 %v321_v47 }
 0x45e   :  { %1103 = vpow2.f32 %v1036_v52 }
 0x46a   :  { %v1102_v49 = vpop.eup %1101 }
 0x46b   :  { %v329_v50 = vmul.f32 %v1102_v49, %v1100_v48  ;;  %v1104_v53 = vpop.eup %1103  ;;  %v328_v55 = vmul.f32 %v1102_v49, %v225_v12 }
 0x46c   :  { %v322_v54 = vadd.f32 1.0, %v1104_v53 }
 0x46d   :  { %331 = vrot.lane.b32.xlu0 %v329_v50, %s1207_s1 }
 0x46e   :  { %1105 = vrcp.f32 %v322_v54 }
 0x471   :  { %341 = vperm.xlu0 %1071, %v1037_v51  }
 0x47b   :  { %v1106_v58 = vpop.eup %1105 }
 0x4df   :  { %v332_v56 = vpop.permute.xlu0 %331 }
 0x4e0   :  { %v334_v57 = vadd.f32 %v332_v56, %v328_v55 }
 0x4e2   :  { %1107 = vtanh.f32 %v334_v57 }
 0x4ec   :  { %v342_v62 = vpop.permute.xlu0 %341 }
 0x4ed   :  { %v344_v63 = vmul.f32 %v342_v62, %v1261_v8  ;;  %v345_v4 = vmul.f32 %v342_v62, %v1267_v15 }
 0x4ef   :  { %v1108_v59 = vpop.eup %1107  ;;  %v346_v0 = vadd.f32 %v344_v63, %v1263_v9  ;;  %v347_v6 = vadd.f32 %v345_v4, %v1269_v16 }
 0x4f0   :  { %v336_v60 = vmul.f32 %v1108_v59, %v1106_v58  ;;  %v1045_v59 = vld [vmem:[%s1532_s0 + $0x28] sm:$0xff] }
 0x4f2   :  { %349 = vrot.lane.b32.xlu1 %v336_v60, %s1207_s1 }
 0x564   :  { %v350_v61 = vpop.permute.xlu1 %349 }
 0x565   :  { %1038 = vmatmul.mubr.msk.f32.vlgmr.msra.gmra.mxu0 %vm127_vm1, %v350_v61 }
 0x566   :  { %588 = vmatpush1.msra.mxu0 %v1275_v25  ;;  %635 = vmatprep.mubr.f32.mxu0 %v1208_v45 }
 0x567   :  { %589 = vmatprep.subr.mxu0 %v1277_v26 }
 0x568   :  { %590 = vmatpush1.msra.mxu0 %v1280_v27 }
 0x569   :  { %591 = vmatprep.subr.mxu0 %v1284_v28 }
 0x56a   :  { %592 = vmatpush1.msra.mxu0 %v1288_v29 }
 0x56b   :  { %593 = vmatprep.subr.mxu0 %v1292_v30 }
 0x56c   :  { %594 = vmatpush1.msra.mxu0 %v1296_v31 }
 0x56d   :  { %595 = vmatprep.subr.mxu0 %v1300_v32 }
 0x56e   :  { %596 = vmatpush1.msra.mxu0 %v1304_v33 }
 0x56f   :  { %597 = vmatprep.subr.mxu0 %v1308_v34 }
 0x570   :  { %598 = vmatpush1.msra.mxu0 %v1312_v36 }
 0x571   :  { %599 = vmatprep.subr.mxu0 %v1317_v37 }
 0x572   :  { %600 = vmatpush1.msra.mxu0 %v1320_v38 }
 0x573   :  { %601 = vmatprep.subr.mxu0 %v1332_v43 }
 0x574   :  { %602 = vmatpush1.msra.mxu0 %v1335_v44 }
 0x575   :  { %805 = vmatprep.subr.mxu0 %v1273_v24 }
 0x625   :  { %v419_v1 = vpop.f32.mrf.mxu0 }
 0x626   :  { %v420_v2 = vadd.f32 %v419_v1, %v346_v0 }
 0x627   :  { %v421_v5 = vpop.f32.mrf.mxu0 }
 0x628   :  { %v1039_v3 = vmul.f32 -1.442695, %v420_v2  ;;  %v422_v7 = vadd.f32 %v421_v5, %v347_v6 }
 0x62a   :  { %1109 = vpow2.f32 %v1039_v3  ;;  %v1040_v18 = vmul.f32 -1.442695, %v422_v7 }
 0x62b   :  { %1111 = vtanh.f32 %v422_v7 }
 0x637   :  { %v1110_v10 = vpop.eup %1109 }
 0x638   :  { %v430_v11 = vadd.f32 1.0, %v1110_v10  ;;  %v1112_v12 = vpop.eup %1111 }
 0x63a   :  { %1113 = vrcp.f32 %v430_v11 }
 0x63b   :  { %1115 = vpow2.f32 %v1040_v18 }
 0x647   :  { %v1114_v13 = vpop.eup %1113 }
 0x648   :  { %v438_v14 = vmul.f32 %v1114_v13, %v1112_v12  ;;  %v1116_v19 = vpop.eup %1115  ;;  %v437_v21 = vmul.f32 %v1114_v13, %v334_v57 }
 0x649   :  { %v431_v20 = vadd.f32 1.0, %v1116_v19 }
 0x64a   :  { %440 = vrot.lane.b32.xlu1 %v438_v14, %s1207_s1 }
 0x64b   :  { %1117 = vrcp.f32 %v431_v20 }
 0x64e   :  { %450 = vperm.xlu1 %1072, %v1041_v17  }
 0x658   :  { %v1118_v35 = vpop.eup %1117 }
 0x6bc   :  { %v441_v22 = vpop.permute.xlu1 %440 }
 0x6bd   :  { %v443_v23 = vadd.f32 %v441_v22, %v437_v21 }
 0x6bf   :  { %1119 = vtanh.f32 %v443_v23 }
 0x6c9   :  { %v451_v42 = vpop.permute.xlu1 %450 }
 0x6ca   :  { %v453_v46 = vmul.f32 %v451_v42, %v1261_v8  ;;  %v454_v51 = vmul.f32 %v451_v42, %v1267_v15 }
 0x6cc   :  { %v1120_v39 = vpop.eup %1119  ;;  %v455_v47 = vadd.f32 %v453_v46, %v1263_v9  ;;  %v456_v53 = vadd.f32 %v454_v51, %v1269_v16 }
 0x6cd   :  { %v445_v40 = vmul.f32 %v1120_v39, %v1118_v35  ;;  %v1049_v39 = vld [vmem:[%s1532_s0 + $0x30] sm:$0xff] }
 0x6cf   :  { %458 = vrot.lane.b32.xlu0 %v445_v40, %s1207_s1 }
 0x741   :  { %v459_v41 = vpop.permute.xlu0 %458 }
 0x742   :  { %1042 = vmatmul.mubr.msk.f32.vlgmr.msra.gmra.mxu1 %vm127_vm1, %v459_v41 }
 0x743   :  { %697 = vmatpush1.msra.mxu1 %v1275_v25  ;;  %744 = vmatprep.mubr.f32.mxu1 %v1208_v45 }
 0x744   :  { %698 = vmatprep.subr.mxu1 %v1277_v26 }
 0x745   :  { %699 = vmatpush1.msra.mxu1 %v1280_v27 }
 0x746   :  { %700 = vmatprep.subr.mxu1 %v1284_v28 }
 0x747   :  { %701 = vmatpush1.msra.mxu1 %v1288_v29 }
 0x748   :  { %702 = vmatprep.subr.mxu1 %v1292_v30 }
 0x749   :  { %703 = vmatpush1.msra.mxu1 %v1296_v31 }
 0x74a   :  { %704 = vmatprep.subr.mxu1 %v1300_v32 }
 0x74b   :  { %705 = vmatpush1.msra.mxu1 %v1304_v33 }
 0x74c   :  { %706 = vmatprep.subr.mxu1 %v1308_v34 }
 0x74d   :  { %707 = vmatpush1.msra.mxu1 %v1312_v36 }
 0x74e   :  { %708 = vmatprep.subr.mxu1 %v1317_v37 }
 0x74f   :  { %709 = vmatpush1.msra.mxu1 %v1320_v38 }
 0x750   :  { %710 = vmatprep.subr.mxu1 %v1332_v43 }
 0x751   :  { %711 = vmatpush1.msra.mxu1 %v1335_v44 }
 0x752   :  { %914 = vmatprep.subr.mxu1 %v1273_v24 }
 0x802   :  { %v528_v48 = vpop.f32.mrf.mxu1 }
 0x803   :  { %v529_v49 = vadd.f32 %v528_v48, %v455_v47 }
 0x804   :  { %v530_v52 = vpop.f32.mrf.mxu1 }
 0x805   :  { %v1043_v50 = vmul.f32 -1.442695, %v529_v49  ;;  %v531_v54 = vadd.f32 %v530_v52, %v456_v53 }
 0x807   :  { %1121 = vpow2.f32 %v1043_v50  ;;  %v1044_v60 = vmul.f32 -1.442695, %v531_v54 }
 0x808   :  { %1123 = vtanh.f32 %v531_v54 }
 0x814   :  { %v1122_v55 = vpop.eup %1121 }
 0x815   :  { %v539_v56 = vadd.f32 1.0, %v1122_v55  ;;  %v1124_v24 = vpop.eup %1123 }
 0x817   :  { %1125 = vrcp.f32 %v539_v56 }
 0x818   :  { %1127 = vpow2.f32 %v1044_v60 }
 0x824   :  { %v1126_v57 = vpop.eup %1125 }
 0x825   :  { %v547_v58 = vmul.f32 %v1126_v57, %v1124_v24  ;;  %v1128_v61 = vpop.eup %1127  ;;  %v546_v63 = vmul.f32 %v1126_v57, %v443_v23 }
 0x826   :  { %v540_v62 = vadd.f32 1.0, %v1128_v61 }
 0x827   :  { %549 = vrot.lane.b32.xlu0 %v547_v58, %s1207_s1 }
 0x828   :  { %1129 = vrcp.f32 %v540_v62 }
 0x82b   :  { %559 = vperm.xlu0 %1071, %v1045_v59  }
 0x835   :  { %v1130_v2 = vpop.eup %1129 }
 0x899   :  { %v550_v0 = vpop.permute.xlu0 %549 }
 0x89a   :  { %v552_v1 = vadd.f32 %v550_v0, %v546_v63 }
 0x89c   :  { %1131 = vtanh.f32 %v552_v1 }
 0x8a6   :  { %v560_v6 = vpop.permute.xlu0 %559 }
 0x8a7   :  { %v562_v7 = vmul.f32 %v560_v6, %v1261_v8  ;;  %v563_v14 = vmul.f32 %v560_v6, %v1267_v15 }
 0x8a9   :  { %v1132_v3 = vpop.eup %1131  ;;  %v564_v10 = vadd.f32 %v562_v7, %v1263_v9  ;;  %v565_v18 = vadd.f32 %v563_v14, %v1269_v16 }
 0x8aa   :  { %v554_v4 = vmul.f32 %v1132_v3, %v1130_v2 }
 0x8ac   :  { %567 = vrot.lane.b32.xlu1 %v554_v4, %s1207_s1 }
 0x91e   :  { %v568_v5 = vpop.permute.xlu1 %567 }
 0x91f   :  { %1046 = vmatmul.mubr.msk.f32.vlgmr.msra.gmra.mxu0 %vm127_vm1, %v568_v5 }
 0x920   :  { %806 = vmatpush1.msra.mxu0 %v1275_v25  ;;  %853 = vmatprep.mubr.f32.mxu0 %v1208_v45 }
 0x921   :  { %807 = vmatprep.subr.mxu0 %v1277_v26 }
 0x922   :  { %808 = vmatpush1.msra.mxu0 %v1280_v27 }
 0x923   :  { %809 = vmatprep.subr.mxu0 %v1284_v28 }
 0x924   :  { %810 = vmatpush1.msra.mxu0 %v1288_v29 }
 0x925   :  { %811 = vmatprep.subr.mxu0 %v1292_v30 }
 0x926   :  { %812 = vmatpush1.msra.mxu0 %v1296_v31 }
 0x927   :  { %813 = vmatprep.subr.mxu0 %v1300_v32 }
 0x928   :  { %814 = vmatpush1.msra.mxu0 %v1304_v33 }
 0x929   :  { %815 = vmatprep.subr.mxu0 %v1308_v34 }
 0x92a   :  { %816 = vmatpush1.msra.mxu0 %v1312_v36 }
 0x92b   :  { %817 = vmatprep.subr.mxu0 %v1317_v37 }
 0x92c   :  { %818 = vmatpush1.msra.mxu0 %v1320_v38 }
 0x92d   :  { %819 = vmatprep.subr.mxu0 %v1332_v43 }
 0x92e   :  { %820 = vmatpush1.msra.mxu0 %v1335_v44 }
 0x9df   :  { %v637_v11 = vpop.f32.mrf.mxu0 }
 0x9e0   :  { %v638_v12 = vadd.f32 %v637_v11, %v564_v10 }
 0x9e1   :  { %v639_v17 = vpop.f32.mrf.mxu0 }
 0x9e2   :  { %v1047_v13 = vmul.f32 -1.442695, %v638_v12  ;;  %v640_v19 = vadd.f32 %v639_v17, %v565_v18  ;;  %v1057_v17 = vld [vmem:[%s1532_s0 + $0x40] sm:$0xff] }
 0x9e4   :  { %1133 = vpow2.f32 %v1047_v13  ;;  %v1048_v40 = vmul.f32 -1.442695, %v640_v19 }
 0x9e5   :  { %1135 = vtanh.f32 %v640_v19 }
 0x9f1   :  { %v1134_v20 = vpop.eup %1133 }
 0x9f2   :  { %v648_v21 = vadd.f32 1.0, %v1134_v20  ;;  %v1136_v22 = vpop.eup %1135 }
 0x9f4   :  { %1137 = vrcp.f32 %v648_v21 }
 0x9f5   :  { %1139 = vpow2.f32 %v1048_v40 }
 0xa01   :  { %v1138_v23 = vpop.eup %1137 }
 0xa02   :  { %v656_v35 = vmul.f32 %v1138_v23, %v1136_v22  ;;  %v1140_v41 = vpop.eup %1139  ;;  %v655_v46 = vmul.f32 %v1138_v23, %v552_v1 }
 0xa03   :  { %v649_v42 = vadd.f32 1.0, %v1140_v41 }
 0xa04   :  { %658 = vrot.lane.b32.xlu1 %v656_v35, %s1207_s1 }
 0xa05   :  { %1141 = vrcp.f32 %v649_v42  ;;  %v1061_v42 = vld [vmem:[%s1536_s4] ss:$0 sm:$0xff]  ;;  %s1210_s4 = smov 32  }
 0xa08   :  { %668 = vperm.xlu1 %1072, %v1049_v39  }
 0xa12   :  { %v1142_v49 = vpop.eup %1141 }
 0xa76   :  { %v659_v47 = vpop.permute.xlu1 %658 }
 0xa77   :  { %v661_v48 = vadd.f32 %v659_v47, %v655_v46 }
 0xa79   :  { %1143 = vtanh.f32 %v661_v48 }
 0xa86   :  { %v1144_v50 = vpop.eup %1143 }
 0xa87   :  { %v663_v51 = vmul.f32 %v1144_v50, %v1142_v49 }
 0xa89   :  { %676 = vrot.lane.b32.xlu0 %v663_v51, %s1207_s1 }
 0xafb   :  { %v677_v52 = vpop.permute.xlu0 %676 }
 0xafc   :  { %1050 = vmatmul.mubr.msk.f32.vlgmr.msra.gmra.mxu1 %vm127_vm1, %v677_v52 }
 0xafd   :  { %915 = vmatpush1.msra.mxu1 %v1275_v25  ;;  %962 = vmatprep.mubr.f32.mxu1 %v1208_v45  ;;  %v669_v25 = vpop.permute.xlu1 %668  ;;  %v1053_v45 = vld [vmem:[%s1532_s0 + $0x38] sm:$0xff] }
 0xafe   :  { %916 = vmatprep.subr.mxu1 %v1277_v26  ;;  %v671_v26 = vmul.f32 %v669_v25, %v1261_v8 }
 0xaff   :  { %917 = vmatpush1.msra.mxu1 %v1280_v27 }
 0xb00   :  { %918 = vmatprep.subr.mxu1 %v1284_v28  ;;  %v673_v27 = vadd.f32 %v671_v26, %v1263_v9 }
 0xb01   :  { %919 = vmatpush1.msra.mxu1 %v1288_v29 }
 0xb02   :  { %920 = vmatprep.subr.mxu1 %v1292_v30 }
 0xb03   :  { %921 = vmatpush1.msra.mxu1 %v1296_v31  ;;  %v672_v31 = vmul.f32 %v669_v25, %v1267_v15 }
 0xb04   :  { %922 = vmatprep.subr.mxu1 %v1300_v32 }
 0xb05   :  { %923 = vmatpush1.msra.mxu1 %v1304_v33  ;;  %v674_v33 = vadd.f32 %v672_v31, %v1269_v16 }
 0xb06   :  { %924 = vmatprep.subr.mxu1 %v1308_v34 }
 0xb07   :  { %925 = vmatpush1.msra.mxu1 %v1312_v36 }
 0xb08   :  { %926 = vmatprep.subr.mxu1 %v1317_v37 }
 0xb09   :  { %927 = vmatpush1.msra.mxu1 %v1320_v38 }
 0xb0a   :  { %928 = vmatprep.subr.mxu1 %v1332_v43 }
 0xb0b   :  { %929 = vmatpush1.msra.mxu1 %v1335_v44 }
 0xbbc   :  { %v746_v28 = vpop.f32.mrf.mxu1 }
 0xbbd   :  { %v747_v29 = vadd.f32 %v746_v28, %v673_v27 }
 0xbbe   :  { %v748_v32 = vpop.f32.mrf.mxu1 }
 0xbbf   :  { %v1051_v30 = vmul.f32 -1.442695, %v747_v29  ;;  %v749_v34 = vadd.f32 %v748_v32, %v674_v33 }
 0xbc1   :  { %1145 = vpow2.f32 %v1051_v30  ;;  %v1052_v53 = vmul.f32 -1.442695, %v749_v34 }
 0xbc2   :  { %1147 = vtanh.f32 %v749_v34 }
 0xbce   :  { %v1146_v36 = vpop.eup %1145 }
 0xbcf   :  { %v757_v37 = vadd.f32 1.0, %v1146_v36  ;;  %v1148_v38 = vpop.eup %1147 }
 0xbd1   :  { %1149 = vrcp.f32 %v757_v37 }
 0xbd2   :  { %1151 = vpow2.f32 %v1052_v53 }
 0xbde   :  { %v1150_v43 = vpop.eup %1149 }
 0xbdf   :  { %v765_v44 = vmul.f32 %v1150_v43, %v1148_v38  ;;  %v1152_v54 = vpop.eup %1151  ;;  %v764_v56 = vmul.f32 %v1150_v43, %v661_v48 }
 0xbe0   :  { %v758_v55 = vadd.f32 1.0, %v1152_v54  ;;  %v1062_v54 = vld [vmem:[#allocation2] ss:$0 sm:$0xff] }
 0xbe1   :  { %767 = vrot.lane.b32.xlu0 %v765_v44, %s1207_s1 }
 0xbe2   :  { %1153 = vrcp.f32 %v758_v55 }
 0xbe5   :  { %777 = vperm.xlu0 %1071, %v1053_v45  }
 0xbef   :  { %v1154_v58 = vpop.eup %1153 }
 0xc53   :  { %v768_v24 = vpop.permute.xlu0 %767 }
 0xc54   :  { %v770_v57 = vadd.f32 %v768_v24, %v764_v56 }
 0xc56   :  { %1155 = vtanh.f32 %v770_v57 }
 0xc60   :  { %v778_v62 = vpop.permute.xlu0 %777 }
 0xc61   :  { %v780_v63 = vmul.f32 %v778_v62, %v1261_v8  ;;  %v781_v4 = vmul.f32 %v778_v62, %v1267_v15 }
 0xc63   :  { %v1156_v59 = vpop.eup %1155  ;;  %v782_v0 = vadd.f32 %v780_v63, %v1263_v9  ;;  %v783_v6 = vadd.f32 %v781_v4, %v1269_v16 }
 0xc64   :  { %v772_v60 = vmul.f32 %v1156_v59, %v1154_v58 }
 0xc66   :  { %785 = vrot.lane.b32.xlu1 %v772_v60, %s1207_s1 }
 0xcd8   :  { %v786_v61 = vpop.permute.xlu1 %785 }
 0xcd9   :  { %1054 = vmatmul.mubr.msk.f32.vlgmr.msra.gmra.mxu0 %vm127_vm1, %v786_v61 }
 0xd99   :  { %v855_v1 = vpop.f32.mrf.mxu0 }
 0xd9a   :  { %v856_v2 = vadd.f32 %v855_v1, %v782_v0 }
 0xd9b   :  { %v857_v5 = vpop.f32.mrf.mxu0 }
 0xd9c   :  { %v1055_v3 = vmul.f32 -1.442695, %v856_v2  ;;  %v858_v7 = vadd.f32 %v857_v5, %v783_v6 }
 0xd9e   :  { %1157 = vpow2.f32 %v1055_v3  ;;  %v1056_v18 = vmul.f32 -1.442695, %v858_v7 }
 0xd9f   :  { %1159 = vtanh.f32 %v858_v7 }
 0xdab   :  { %v1158_v10 = vpop.eup %1157 }
 0xdac   :  { %v866_v11 = vadd.f32 1.0, %v1158_v10  ;;  %v1160_v12 = vpop.eup %1159 }
 0xdae   :  { %1161 = vrcp.f32 %v866_v11 }
 0xdaf   :  { %1163 = vpow2.f32 %v1056_v18 }
 0xdbb   :  { %v1162_v13 = vpop.eup %1161 }
 0xdbc   :  { %v874_v14 = vmul.f32 %v1162_v13, %v1160_v12  ;;  %v1164_v19 = vpop.eup %1163  ;;  %v873_v21 = vmul.f32 %v1162_v13, %v770_v57 }
 0xdbd   :  { %v867_v20 = vadd.f32 1.0, %v1164_v19 }
 0xdbe   :  { %876 = vrot.lane.b32.xlu1 %v874_v14, %s1207_s1 }
 0xdbf   :  { %1165 = vrcp.f32 %v867_v20 }
 0xdc2   :  { %886 = vperm.xlu1 %1072, %v1057_v17  }
 0xdc6   :  { %997 = vrot.lane.b32.xlu1 %v1061_v42, %s1209_s26 }
 0xdcc   :  { %v1166_v35 = vpop.eup %1165 }
 0xe30   :  { %v877_v22 = vpop.permute.xlu1 %876 }
 0xe31   :  { %v879_v23 = vadd.f32 %v877_v22, %v873_v21 }
 0xe33   :  { %1167 = vtanh.f32 %v879_v23 }
 0xe3d   :  { %v887_v46 = vpop.permute.xlu1 %886 }
 0xe3e   :  { %v889_v47 = vmul.f32 %v887_v46, %v1261_v8  ;;  %v890_v52 = vmul.f32 %v887_v46, %v1267_v15 }
 0xe40   :  { %v1168_v39 = vpop.eup %1167  ;;  %v891_v48 = vadd.f32 %v889_v47, %v1263_v9  ;;  %v892_v26 = vadd.f32 %v890_v52, %v1269_v16 }
 0xe41   :  { %v881_v40 = vmul.f32 %v1168_v39, %v1166_v35  ;;  %v998_v38 = vpop.permute.xlu1 %997 }
 0xe43   :  { %894 = vrot.lane.b32.xlu0 %v881_v40, %s1207_s1 }
 0xeb5   :  { %v895_v41 = vpop.permute.xlu0 %894 }
 0xeb6   :  { %1058 = vmatmul.mubr.msk.f32.vlgmr.msra.gmra.mxu1 %vm127_vm1, %v895_v41 }
 0xf76   :  { %v964_v49 = vpop.f32.mrf.mxu1 }
 0xf77   :  { %v965_v50 = vadd.f32 %v964_v49, %v891_v48 }
 0xf78   :  { %v966_v25 = vpop.f32.mrf.mxu1 }
 0xf79   :  { %v1059_v51 = vmul.f32 -1.442695, %v965_v50  ;;  %v967_v27 = vadd.f32 %v966_v25, %v892_v26 }
 0xf7b   :  { %1169 = vpow2.f32 %v1059_v51  ;;  %v1060_v8 = vmul.f32 -1.442695, %v967_v27 }
 0xf7c   :  { %1171 = vtanh.f32 %v967_v27 }
 0xf88   :  { %v1170_v28 = vpop.eup %1169 }
 0xf89   :  { %v975_v29 = vadd.f32 1.0, %v1170_v28  ;;  %v1172_v30 = vpop.eup %1171 }
 0xf8b   :  { %1173 = vrcp.f32 %v975_v29 }
 0xf8c   :  { %1175 = vpow2.f32 %v1060_v8 }
 0xf98   :  { %v1174_v31 = vpop.eup %1173 }
 0xf99   :  { %v983_v32 = vmul.f32 %v1174_v31, %v1172_v30  ;;  %v1176_v9 = vpop.eup %1175  ;;  %v982_v34 = vmul.f32 %v1174_v31, %v879_v23 }
 0xf9a   :  { %v976_v33 = vadd.f32 1.0, %v1176_v9 }
 0xf9b   :  { %985 = vrot.lane.b32.xlu0 %v983_v32, %s1207_s1 }
 0xf9c   :  { %1177 = vrcp.f32 %v976_v33 }
 0xfa9   :  { %v1178_v16 = vpop.eup %1177 }
0x100d   :  { %v986_v36 = vpop.permute.xlu0 %985 }
0x100e   :  { %v988_v15 = vadd.f32 %v986_v36, %v982_v34 }
0x1010   :  { %1179 = vtanh.f32 %v988_v15 }
0x101d   :  { %v1180_v37 = vpop.eup %1179 }
0x101e   :  { %v990_v43 = vmul.f32 %v1180_v37, %v1178_v16 }
0x1020   :  { %v1000_v44 = vmul.f32 %v998_v38, %v990_v43 }
0x1022   :  { %1002 = vrot.lane.b32.xlu0 %v1000_v44, %s1210_s4 }
0x1094   :  { %v1003_v45 = vpop.permute.xlu0 %1002 }
0x1095   :  { %v1005_v53 = vsel %vm113_vm0, %v1003_v45, 0.0 }
0x1096   :  { %1006 = vadd.xlane.f32.xlu1 %v1005_v53 }
0x111f   :  { %v1007_v55 = vpop.xlane.xlu1 %1006 }
0x1120   :  { %v1015_v56 = vadd.f32 %v1062_v54, %v1007_v55 }
0x1122   :  { %1018 = vperm.xlu0 %1071, %v1015_v56  }
0x119d   :  { %v1019_v24 = vpop.permute.xlu0 %1018 }
0x119e   :  { %1021 = vst [vmem:[%s1538_s6] sm:$0xff] %v1019_v24 }
0x119f   :  { %1026 = vsyncpa [#allocation4], 1 }

</bundles_post_ra>
